<compile_context>
chip_gen: v6e
topology: v6e:2x2x1
jax: 0.10.0
libtpu: 0.0.40
codegen_flags: <defaults>
</compile_context>

<pallas_src>
import functools

import jax
import jax.numpy as jnp
from jax import lax
from jax.experimental import pallas as pl
from jax.experimental.pallas import tpu as pltpu

_LANE = 128     # lane width (last dim) -> dense vst + full MXU columns
_SUBLANE = 8    # f32 sublane granularity


def _round_up(x, m):
    return (x + m - 1) // m * m


# ---------------------------------------------------------------------------
# Activations (mirrors the ACTIVATIONS dict of the PyTorch module)
# ---------------------------------------------------------------------------
def _activation(y, act):
    if act in (None, "none"):
        return y
    if act == "relu":
        return jnp.maximum(y, 0.0)
    if act == "tanh":
        return jnp.tanh(y)
    if act == "sigmoid":
        return jax.nn.sigmoid(y)
    if act == "softmax":
        m = jnp.max(y, axis=-1, keepdims=True)
        e = jnp.exp(y - m)
        return e / jnp.sum(e, axis=-1, keepdims=True)
    if act == "logsoftmax":
        m = jnp.max(y, axis=-1, keepdims=True)
        s = y - m
        return s - jnp.log(jnp.sum(jnp.exp(s), axis=-1, keepdims=True))
    if act == "lrelu":
        # nn.LeakyReLU default negative_slope = 0.01
        return jnp.where(y >= 0, y, 0.01 * y)
    raise ValueError(f"unknown activation: {act}")


def _activation_padded(y, act, true_dim):
    """Activation on a (tm, d_pad) tile whose valid width is `true_dim`.

    Only softmax / logsoftmax need lane masking: their row reduction would be
    polluted by padded lanes, and logsoftmax would put -inf there (which would
    become NaN in the next matmul).  Every other activation maps the zero-padded
    lanes to finite values that the next layer's zero weight rows annihilate.
    """
    d_pad = y.shape[-1]
    if act in ("softmax", "logsoftmax") and true_dim < d_pad:
        lane = lax.broadcasted_iota(jnp.int32, y.shape, dimension=y.ndim - 1)
        y = jnp.where(lane < true_dim, y, -jnp.inf)
        h = _activation(y, act)
        return jnp.where(lane < true_dim, h, 0.0)
    return _activation(y, act)


# ---------------------------------------------------------------------------
# Fused kernel: all layers, activations stay in VMEM, one HBM write at the end
# ---------------------------------------------------------------------------
def fused_mlp_kernel(*refs, acts, true_dims, compute_dtype):
    # refs = (x_ref, w0, b0, w1, b1, ..., o_ref)
    x_ref = refs[0]
    o_ref = refs[-1]
    wb = refs[1:-1]

    h = x_ref[...]                              # (tm, d_in_pad)
    for l, act in enumerate(acts):              # static unroll over layers
        w_ref = wb[2 * l]                       # (din_pad_l, dout_pad_l)
        b_ref = wb[2 * l + 1]                   # (1, dout_pad_l)
        y = jnp.dot(h.astype(compute_dtype), w_ref[...].astype(compute_dtype),
                    preferred_element_type=jnp.float32)
        y = y + b_ref[...]                      # bias + activation once per tile
        h = _activation_padded(y, act, true_dims[l])
    o_ref[...] = h.astype(o_ref.dtype)


def mlp_forward(x, params, nonlins, *, compute_dtype=jnp.float32, row_tile=256):
    """Fused MLP forward pass as a single Pallas TPU kernel.

    params[l] = (W_l, b_l) with W_l of shape (d_in, d_out) (i.e. PyTorch's
    weight transposed) so the kernel computes y = x @ W + b.
    """
    assert len(params) == len(nonlins)
    N, in_dim = x.shape
    dims = [int(w.shape[1]) for (w, _) in params]
    L = len(params)

    # Per-layer lane-dense padding; rows padded to a /8-aligned row tile.
    d_in_pad = _round_up(in_dim, _LANE)
    din_pads = [d_in_pad] + [_round_up(d, _LANE) for d in dims[:-1]]
    dout_pads = [_round_up(d, _LANE) for d in dims]
    tm = min(row_tile, _round_up(N, _SUBLANE))
    n_pad = _round_up(N, tm)

    x_p = jnp.pad(x, ((0, n_pad - N), (0, d_in_pad - in_dim)))
    wb_inputs = []
    for l, (w, b) in enumerate(params):
        w_p = jnp.pad(w.astype(jnp.float32),
                      ((0, din_pads[l] - w.shape[0]), (0, dout_pads[l] - w.shape[1])))
        b_p = jnp.pad(b.astype(jnp.float32),
                      (0, dout_pads[l] - b.shape[0])).reshape(1, dout_pads[l])
        wb_inputs += [w_p, b_p]

    kernel = functools.partial(
        fused_mlp_kernel,
        acts=tuple(nonlins),
        true_dims=tuple(dims),
        compute_dtype=compute_dtype,
    )

    # BlockSpecs: x/out tiled over rows; weights & biases constant-block
    # (resident in VMEM across the whole row grid).
    in_specs = [pl.BlockSpec((tm, d_in_pad), lambda i: (i, 0))]
    for l in range(L):
        in_specs.append(pl.BlockSpec((din_pads[l], dout_pads[l]), lambda i: (0, 0)))
        in_specs.append(pl.BlockSpec((1, dout_pads[l]), lambda i: (0, 0)))
    out_spec = pl.BlockSpec((tm, dout_pads[-1]), lambda i: (i, 0))

    # Scheduling hints for XLA around the custom call (true-dim arithmetic).
    flops = sum(2 * N * di * do for di, do in zip([in_dim] + dims[:-1], dims))
    transcendentals = sum(
        N * do for do, a in zip(dims, nonlins)
        if a in ("tanh", "sigmoid", "softmax", "logsoftmax")
    )
    weight_elems = sum(din_pads[l] * dout_pads[l] for l in range(L))
    bias_elems = sum(dout_pads)
    bytes_accessed = 4 * (x_p.size + weight_elems + bias_elems
                          + n_pad * dout_pads[-1])

    # VMEM budget: double-buffered x/out row tiles, resident weights/biases,
    # plus slack for the live activation tiles.
    act_elems = tm * max([d_in_pad] + dout_pads)
    vmem_bytes = 4 * (2 * tm * d_in_pad + 2 * tm * dout_pads[-1]
                      + 2 * weight_elems + 2 * bias_elems + 4 * act_elems)
    vmem_bytes = int(min(max(vmem_bytes, 4 << 20), 48 << 20))

    out_padded = pl.pallas_call(
        kernel,
        out_shape=jax.ShapeDtypeStruct((n_pad, dout_pads[-1]), x.dtype),
        grid=(n_pad // tm,),
        in_specs=in_specs,
        out_specs=out_spec,
        compiler_params=pltpu.CompilerParams(
            dimension_semantics=("parallel",),   # shard row tiles across TCs (v7x)
            vmem_limit_bytes=vmem_bytes,
        ),
        cost_estimate=pl.CostEstimate(
            flops=flops,
            transcendentals=transcendentals,
            bytes_accessed=bytes_accessed,
        ),
    )(x_p, *wb_inputs)

    return out_padded[:N, : dims[-1]]


# ---------------------------------------------------------------------------
# Params (PyTorch nn.Linear default init) + pure-JAX reference
# ---------------------------------------------------------------------------
def init_mlp_params(key, in_dim, dims):
    """Mimics nn.Linear default init: U(-1/sqrt(fan_in), 1/sqrt(fan_in))."""
    params = []
    in_features = in_dim
    for out_features in dims:
        key, kw, kb = jax.random.split(key, 3)
        bound = 1.0 / jnp.sqrt(float(in_features))
        # Stored as (D_in, D_out) — transposed relative to PyTorch's (out, in).
        w = jax.random.uniform(kw, (in_features, out_features),
                               minval=-bound, maxval=bound, dtype=jnp.float32)
        b = jax.random.uniform(kb, (out_features,),
                               minval=-bound, maxval=bound, dtype=jnp.float32)
        params.append((w, b))
        in_features = out_features
    return params


def mlp_forward_ref(x, params, nonlins):
    h = x
    for (w, b), act in zip(params, nonlins):
        h = _activation(h @ w + b, act)
    return h


if __name__ == "__main__":
    key = jax.random.PRNGKey(0)

    # Small MLP consistent with the PyTorch module: (N, D) input, per-layer acts.
    N, in_dim = 20, 32                 # N not a multiple of 8 -> exercises row padding
    dims = [64, 48, 16]
    nonlins = ["relu", "tanh", "none"]

    key, kx, kp = jax.random.split(key, 3)
    x = jax.random.normal(kx, (N, in_dim), dtype=jnp.float32)
    params = init_mlp_params(kp, in_dim, dims)

    out = jax.block_until_ready(mlp_forward(x, params, nonlins))
    ref = mlp_forward_ref(x, params, nonlins)
    assert out.shape == (N, dims[-1])
    assert jnp.allclose(out, ref, atol=1e-4, rtol=1e-4), "mismatch vs reference (cfg 1)"

    # Second config exercises lrelu/sigmoid and the padded-lane softmax masking.
    nonlins2 = ["lrelu", "sigmoid", "softmax"]
    out2 = jax.block_until_ready(mlp_forward(x, params, nonlins2))
    ref2 = mlp_forward_ref(x, params, nonlins2)
    assert jnp.allclose(out2, ref2, atol=1e-4, rtol=1e-4), "mismatch vs reference (cfg 2)"
    assert jnp.allclose(out2.sum(-1), 1.0, atol=1e-4), "softmax rows must sum to 1"

    # Third config covers logsoftmax (padded lanes must be neutralized mid-network).
    nonlins3 = ["logsoftmax", "relu", "none"]
    out3 = jax.block_until_ready(mlp_forward(x, params, nonlins3))
    ref3 = mlp_forward_ref(x, params, nonlins3)
    assert jnp.allclose(out3, ref3, atol=1e-4, rtol=1e-4), "mismatch vs reference (cfg 3)"

    print("KERNEL_OK")
</pallas_src>

<mosaic_0001>
module attributes {stable_mosaic.version = 11 : i64} {
  func.func @fused_mlp_kernel(%arg0: i32, %arg1: memref<24x128xf32, #tpu.memory_space<vmem>>, %arg2: memref<128x128xf32, #tpu.memory_space<vmem>>, %arg3: memref<1x128xf32, #tpu.memory_space<vmem>>, %arg4: memref<128x128xf32, #tpu.memory_space<vmem>>, %arg5: memref<1x128xf32, #tpu.memory_space<vmem>>, %arg6: memref<128x128xf32, #tpu.memory_space<vmem>>, %arg7: memref<1x128xf32, #tpu.memory_space<vmem>>, %arg8: memref<24x128xf32, #tpu.memory_space<vmem>>) attributes {dimension_semantics = [#tpu.dimension_semantics<parallel>], iteration_bounds = array<i64: 1>, scalar_prefetch = 0 : i64, scratch_operands = 0 : i64, tpu.core_type = #tpu.core_type<tc>, window_params = [{transform_indices = @transform_0, window_bounds = array<i64: 24, 128>}, {pipeline_mode = #tpu.pipeline_mode<synchronous>, transform_indices = @transform_1, window_bounds = array<i64: 128, 128>}, {pipeline_mode = #tpu.pipeline_mode<synchronous>, transform_indices = @transform_2, window_bounds = array<i64: 1, 128>}, {pipeline_mode = #tpu.pipeline_mode<synchronous>, transform_indices = @transform_3, window_bounds = array<i64: 128, 128>}, {pipeline_mode = #tpu.pipeline_mode<synchronous>, transform_indices = @transform_4, window_bounds = array<i64: 1, 128>}, {pipeline_mode = #tpu.pipeline_mode<synchronous>, transform_indices = @transform_5, window_bounds = array<i64: 128, 128>}, {pipeline_mode = #tpu.pipeline_mode<synchronous>, transform_indices = @transform_6, window_bounds = array<i64: 1, 128>}, {transform_indices = @transform_7, window_bounds = array<i64: 24, 128>}]} {
    %c0 = arith.constant 0 : index
    %c0_0 = arith.constant 0 : index
    %0 = vector.load %arg1[%c0, %c0_0] : memref<24x128xf32, #tpu.memory_space<vmem>>, vector<24x128xf32>
    %c0_1 = arith.constant 0 : index
    %c0_2 = arith.constant 0 : index
    %1 = vector.load %arg2[%c0_1, %c0_2] : memref<128x128xf32, #tpu.memory_space<vmem>>, vector<128x128xf32>
    %cst = arith.constant dense<0.000000e+00> : vector<24x128xf32>
    %2 = tpu.matmul %0, %1, %cst {dimension_numbers = #tpu.dot_dimension_numbers<[1], [0], [0], [1], [0, 0, 1, 1], [], []>} : vector<24x128xf32>, vector<128x128xf32>, vector<24x128xf32> -> vector<24x128xf32>
    %c0_3 = arith.constant 0 : index
    %c0_4 = arith.constant 0 : index
    %3 = vector.load %arg3[%c0_3, %c0_4] : memref<1x128xf32, #tpu.memory_space<vmem>>, vector<1x128xf32>
    %4 = vector.broadcast %3 : vector<1x128xf32> to vector<24x128xf32>
    %5 = arith.addf %2, %4 : vector<24x128xf32>
    %cst_5 = arith.constant 0.000000e+00 : f32
    %6 = vector.broadcast %cst_5 : f32 to vector<24x128xf32>
    %7 = arith.maximumf %5, %6 : vector<24x128xf32>
    %c0_6 = arith.constant 0 : index
    %c0_7 = arith.constant 0 : index
    %8 = vector.load %arg4[%c0_6, %c0_7] : memref<128x128xf32, #tpu.memory_space<vmem>>, vector<128x128xf32>
    %cst_8 = arith.constant dense<0.000000e+00> : vector<24x128xf32>
    %9 = tpu.matmul %7, %8, %cst_8 {dimension_numbers = #tpu.dot_dimension_numbers<[1], [0], [0], [1], [0, 0, 1, 1], [], []>} : vector<24x128xf32>, vector<128x128xf32>, vector<24x128xf32> -> vector<24x128xf32>
    %c0_9 = arith.constant 0 : index
    %c0_10 = arith.constant 0 : index
    %10 = vector.load %arg5[%c0_9, %c0_10] : memref<1x128xf32, #tpu.memory_space<vmem>>, vector<1x128xf32>
    %11 = vector.broadcast %10 : vector<1x128xf32> to vector<24x128xf32>
    %12 = arith.addf %9, %11 : vector<24x128xf32>
    %13 = math.tanh %12 : vector<24x128xf32>
    %c0_11 = arith.constant 0 : index
    %c0_12 = arith.constant 0 : index
    %14 = vector.load %arg6[%c0_11, %c0_12] : memref<128x128xf32, #tpu.memory_space<vmem>>, vector<128x128xf32>
    %cst_13 = arith.constant dense<0.000000e+00> : vector<24x128xf32>
    %15 = tpu.matmul %13, %14, %cst_13 {dimension_numbers = #tpu.dot_dimension_numbers<[1], [0], [0], [1], [0, 0, 1, 1], [], []>} : vector<24x128xf32>, vector<128x128xf32>, vector<24x128xf32> -> vector<24x128xf32>
    %c0_14 = arith.constant 0 : index
    %c0_15 = arith.constant 0 : index
    %16 = vector.load %arg7[%c0_14, %c0_15] : memref<1x128xf32, #tpu.memory_space<vmem>>, vector<1x128xf32>
    %17 = vector.broadcast %16 : vector<1x128xf32> to vector<24x128xf32>
    %18 = arith.addf %15, %17 : vector<24x128xf32>
    %c0_16 = arith.constant 0 : index
    %c0_17 = arith.constant 0 : index
    %19 = vector.load %arg8[%c0_16, %c0_17] : memref<24x128xf32, #tpu.memory_space<vmem>>, vector<24x128xf32>
    tpu.vector_store %arg8[%c0_16, %c0_17], %18 {strides = array<i32>} : memref<24x128xf32, #tpu.memory_space<vmem>>, vector<24x128xf32>,
    return
  }
  func.func @transform_0(%arg0: i32) -> (i32, i32) {
    %c0_i32 = arith.constant 0 : i32
    %c0_i32_0 = arith.constant 0 : i32
    return %arg0, %c0_i32 : i32, i32
  }
  func.func @transform_1(%arg0: i32) -> (i32, i32) {
    %c0_i32 = arith.constant 0 : i32
    %c0_i32_0 = arith.constant 0 : i32
    %c0_i32_1 = arith.constant 0 : i32
    return %c0_i32, %c0_i32_0 : i32, i32
  }
  func.func @transform_2(%arg0: i32) -> (i32, i32) {
    %c0_i32 = arith.constant 0 : i32
    %c0_i32_0 = arith.constant 0 : i32
    %c0_i32_1 = arith.constant 0 : i32
    return %c0_i32, %c0_i32_0 : i32, i32
  }
  func.func @transform_3(%arg0: i32) -> (i32, i32) {
    %c0_i32 = arith.constant 0 : i32
    %c0_i32_0 = arith.constant 0 : i32
    %c0_i32_1 = arith.constant 0 : i32
    return %c0_i32, %c0_i32_0 : i32, i32
  }
  func.func @transform_4(%arg0: i32) -> (i32, i32) {
    %c0_i32 = arith.constant 0 : i32
    %c0_i32_0 = arith.constant 0 : i32
    %c0_i32_1 = arith.constant 0 : i32
    return %c0_i32, %c0_i32_0 : i32, i32
  }
  func.func @transform_5(%arg0: i32) -> (i32, i32) {
    %c0_i32 = arith.constant 0 : i32
    %c0_i32_0 = arith.constant 0 : i32
    %c0_i32_1 = arith.constant 0 : i32
    return %c0_i32, %c0_i32_0 : i32, i32
  }
  func.func @transform_6(%arg0: i32) -> (i32, i32) {
    %c0_i32 = arith.constant 0 : i32
    %c0_i32_0 = arith.constant 0 : i32
    %c0_i32_1 = arith.constant 0 : i32
    return %c0_i32, %c0_i32_0 : i32, i32
  }
  func.func @transform_7(%arg0: i32) -> (i32, i32) {
    %c0_i32 = arith.constant 0 : i32
    %c0_i32_0 = arith.constant 0 : i32
    return %arg0, %c0_i32 : i32, i32
  }
}

</mosaic_0001>

<bundles_post_ra>
// kernel: tpu_custom_call.1
= control target key start
LH: loop header
LB: loop body
LE: loop exit
PB: predicated region body
PF: predicated region fallthrough
CT: control target
= control target key end

     0   :  { %12 = vsyncpa [#allocation3], 0  ;;  %s930_s0 = inlined_call_operand.hbm [shape: f32[24,128], index: 0, kind: input, shape index: {}]   ;;  %s931_s1 = inlined_call_operand.hbm [shape: f32[128,128], index: 1, kind: input, shape index: {}]   ;;  %s932_s2 = inlined_call_operand.vmem [shape: f32[1,128], index: 2, kind: input, shape index: {}]   ;;  %s933_s3 = inlined_call_operand.hbm [shape: f32[128,128], index: 3, kind: input, shape index: {}]   ;;  %s934_s4 = inlined_call_operand.vmem [shape: f32[1,128], index: 4, kind: input, shape index: {}]   ;;  %s935_s5 = inlined_call_operand.hbm [shape: f32[128,128], index: 5, kind: input, shape index: {}]   ;;  %s936_s6 = inlined_call_operand.vmem [shape: f32[1,128], index: 6, kind: input, shape index: {}]   ;;  %s937_s7 = inlined_call_operand.hbm [shape: f32[24,128], index: 7, kind: output, shape index: {}]  }
   0x1   :  { %13 = vsyncpa [#allocation6], 0 }
   0x2   :  { %14 = vsyncpa [#allocation9], 0 }
   0x3   :  { %15 = vsyncpa [#allocation4], 0  ;;  %s760_s24 = smov [#allocation5]   ;;  %s761_s26 = smov [#allocation2]  }
   0x4   :  { %s33_s25 = sshll.u32 %s760_s24, 4  ;;  %s21_s27 = sshll.u32 %s761_s26, 4  ;;  %s34_s25 = int_to_ptr.vmem [resolvable:$true] %s33_s25  ;;  %s22_s27 = int_to_ptr.vmem [resolvable:$true] %s21_s27 }
   0x5   :  { %s660_s28 = scalar_lea.vmem %s34_s25, 2048  ;;  %p665_p1 = scmp.lt.s32.totalorder %s34_s25, %s34_s25 }
   0x6   :  { %p661_p0 = scmp.ne.s32.totalorder %s34_s25, %s660_s28  ;;  %p666_p2 = scmp.lt.s32.totalorder %s660_s28, %s660_s28 }
   0x8   :  { %p667_p3 = por %p666_p2, %p665_p1 }
   0xa   :  { %p668_p4 = pnand %p667_p3, %p661_p0 }
   0xc   :  { %671 = shalt.err (!%p668_p4)
}
   0xd   :  { %s762_s29 = smov 128   ;;  %s763_s30 = smov 8  }
   0xe   :  { %39 = dma.hbm_to_vmem [thread:$0]  %s931_s1, 2048, %s34_s25, [#allocation6], %s762_s29, %s762_s29, %s763_s30  }
   0xf   :  { %s680_s10 = scalar_lea.vmem %s22_s27, 384  ;;  %p685_p6 = scmp.lt.s32.totalorder %s22_s27, %s22_s27 }
  0x10   :  { %p681_p5 = scmp.ne.s32.totalorder %s22_s27, %s680_s10  ;;  %p686_p7 = scmp.lt.s32.totalorder %s680_s10, %s680_s10 }
  0x12   :  { %p687_p8 = por %p686_p7, %p685_p6 }
  0x14   :  { %p688_p9 = pnand %p687_p8, %p681_p5 }
  0x16   :  { %691 = shalt.err (!%p688_p9)
}
  0x17   :  { %27 = dma.hbm_to_vmem [thread:$0]  %s930_s0, 384, %s22_s27, [#allocation3], %s762_s29, %s762_s29, %s763_s30  }
  0x18   :  { %s764_s13 = smov [#allocation7]   ;;  %s765_s15 = smov [#allocation8]  }
  0x19   :  { %s47_s14 = sshll.u32 %s764_s13, 4  ;;  %s61_s16 = sshll.u32 %s765_s15, 4  ;;  %s48_s14 = int_to_ptr.vmem [resolvable:$true] %s47_s14  ;;  %s62_s16 = int_to_ptr.vmem [resolvable:$true] %s61_s16 }
  0x1a   :  { %s700_s1 = scalar_lea.vmem %s48_s14, 2048  ;;  %p705_p11 = scmp.lt.s32.totalorder %s48_s14, %s48_s14 }
  0x1b   :  { %p701_p10 = scmp.ne.s32.totalorder %s48_s14, %s700_s1  ;;  %p706_p12 = scmp.lt.s32.totalorder %s700_s1, %s700_s1 }
  0x1d   :  { %p707_p13 = por %p706_p12, %p705_p11 }
  0x1f   :  { %p708_p0 = pnand %p707_p13, %p701_p10 }
  0x21   :  { %711 = shalt.err (!%p708_p0)
}
  0x22   :  { %53 = dma.hbm_to_vmem [thread:$0]  %s933_s3, 2048, %s48_s14, [#allocation6], %s762_s29, %s762_s29, %s763_s30  }
  0x23   :  { %s720_s0 = scalar_lea.vmem %s62_s16, 2048  ;;  %p725_p2 = scmp.lt.s32.totalorder %s62_s16, %s62_s16 }
  0x24   :  { %p721_p1 = scmp.ne.s32.totalorder %s62_s16, %s720_s0  ;;  %p726_p3 = scmp.lt.s32.totalorder %s720_s0, %s720_s0 }
  0x26   :  { %p727_p4 = por %p726_p3, %p725_p2 }
  0x28   :  { %p728_p5 = pnand %p727_p4, %p721_p1 }
  0x2a   :  { %731 = shalt.err (!%p728_p5)
}
  0x2b   :  { %67 = dma.hbm_to_vmem [thread:$0]  %s935_s5, 2048, %s62_s16, [#allocation9], %s762_s29, %s762_s29, %s763_s30  }
  0x2c   :  { %752 = dma.done.wait [#allocation3], 384  }
  0x2d   :  { %753 = vsyncadd [#allocation3], 4294966912 }
  0x2e   :  { %754 = dma.done.wait [#allocation6], 4096  }
  0x2f   :  { %755 = vsyncadd [#allocation6], 4294963200 }
  0x30   :  { %756 = dma.done.wait [#allocation9], 2048  }
  0x31   :  { %757 = vsyncadd [#allocation9], 4294965248  ;;  %v766_v0 = vmov 0.0   ;;  %vm767_vm0 = vmmov 0   ;;  %v100_v1 = vld [vmem:[#allocation5 + $0x78] sm:$0xff]  ;;  %v99_v2 = vld [vmem:[#allocation5 + $0x70] sm:$0xff] }
  0x32   :  { %482 = vmatprep.subr.mxu0 %v766_v0  ;;  %514 = vmatprep.mubr.msk.f32.mxu0 %vm767_vm0, %v766_v0  ;;  %v98_v3 = vld [vmem:[#allocation5 + $0x68] sm:$0xff]  ;;  %v97_v4 = vld [vmem:[#allocation5 + $0x60] sm:$0xff]  ;;  %v96_v5 = vld [vmem:[#allocation5 + $0x58] sm:$0xff]  ;;  %s768_s23 = smov [#allocation10]  }
  0x33   :  { %523 = vmatprep.subr.mxu1 %v766_v0  ;;  %555 = vmatprep.mubr.msk.f32.mxu1 %vm767_vm0, %v766_v0  ;;  %v206_v6 = vld [vmem:[#allocation7 + $0x78] sm:$0xff]  ;;  %v205_v7 = vld [vmem:[#allocation7 + $0x70] sm:$0xff]  ;;  %v204_v9 = vld [vmem:[#allocation7 + $0x68] sm:$0xff]  ;;  %s408_s24 = sshll.u32 %s768_s23, 4  ;;  %s409_s24 = int_to_ptr.vmem [resolvable:$true] %s408_s24 }
  0x34   :  { %483 = vmatpush3.msra.mxu0 %v100_v1  ;;  %524 = vmatpush3.msra.mxu1 %v206_v6  ;;  %v95_v8 = vld [vmem:[#allocation5 + $0x50] sm:$0xff]  ;;  %v94_v10 = vld [vmem:[#allocation5 + $0x48] sm:$0xff]  ;;  %v203_v11 = vld [vmem:[#allocation7 + $0x60] sm:$0xff]  ;;  %s732_s25 = scalar_lea.vmem %s409_s24, 384  ;;  %p737_p7 = scmp.lt.s32.totalorder %s409_s24, %s409_s24 }
  0x35   :  { %484 = vmatprep.subr.mxu0 %v766_v0  ;;  %525 = vmatprep.subr.mxu1 %v766_v0  ;;  %v93_v12 = vld [vmem:[#allocation5 + $0x40] sm:$0xff]  ;;  %v202_v13 = vld [vmem:[#allocation7 + $0x58] sm:$0xff]  ;;  %v201_v15 = vld [vmem:[#allocation7 + $0x50] sm:$0xff]  ;;  %p733_p6 = scmp.ne.s32.totalorder %s409_s24, %s732_s25  ;;  %p738_p8 = scmp.lt.s32.totalorder %s732_s25, %s732_s25 }
  0x36   :  { %485 = vmatpush3.msra.mxu0 %v99_v2  ;;  %526 = vmatpush3.msra.mxu1 %v205_v7  ;;  %v92_v14 = vld [vmem:[#allocation5 + $0x38] sm:$0xff]  ;;  %v91_v16 = vld [vmem:[#allocation5 + $0x30] sm:$0xff]  ;;  %v200_v17 = vld [vmem:[#allocation7 + $0x48] sm:$0xff] }
  0x37   :  { %486 = vmatprep.subr.mxu0 %v766_v0  ;;  %527 = vmatprep.subr.mxu1 %v766_v0  ;;  %v90_v18 = vld [vmem:[#allocation5 + $0x28] sm:$0xff]  ;;  %v199_v19 = vld [vmem:[#allocation7 + $0x40] sm:$0xff]  ;;  %v198_v21 = vld [vmem:[#allocation7 + $0x38] sm:$0xff]  ;;  %p739_p9 = por %p738_p8, %p737_p7 }
  0x38   :  { %487 = vmatpush3.msra.mxu0 %v98_v3  ;;  %528 = vmatpush3.msra.mxu1 %v204_v9  ;;  %v89_v20 = vld [vmem:[#allocation5 + $0x20] sm:$0xff]  ;;  %v88_v22 = vld [vmem:[#allocation5 + $0x18] sm:$0xff]  ;;  %v197_v23 = vld [vmem:[#allocation7 + $0x30] sm:$0xff] }
  0x39   :  { %488 = vmatprep.subr.mxu0 %v766_v0  ;;  %529 = vmatprep.subr.mxu1 %v766_v0  ;;  %v87_v24 = vld [vmem:[#allocation5 + $0x10] sm:$0xff]  ;;  %v196_v25 = vld [vmem:[#allocation7 + $0x28] sm:$0xff]  ;;  %v195_v27 = vld [vmem:[#allocation7 + $0x20] sm:$0xff]  ;;  %p740_p10 = pnand %p739_p9, %p733_p6 }
  0x3a   :  { %489 = vmatpush3.msra.mxu0 %v97_v4  ;;  %530 = vmatpush3.msra.mxu1 %v203_v11  ;;  %v86_v26 = vld [vmem:[#allocation5 + $0x8] sm:$0xff]  ;;  %v85_v28 = vld [vmem:[#allocation5] sm:$0xff]  ;;  %v194_v29 = vld [vmem:[#allocation7 + $0x18] sm:$0xff] }
  0x3b   :  { %490 = vmatprep.subr.mxu0 %v766_v0  ;;  %531 = vmatprep.subr.mxu1 %v766_v0  ;;  %v82_v30 = vld [vmem:[#allocation2] sm:$0xff]  ;;  %v83_v31 = vld [vmem:[#allocation2 + $0x8] sm:$0xff]  ;;  %v84_v32 = vld [vmem:[#allocation2 + $0x10] sm:$0xff] }
  0x3c   :  { %491 = vmatpush3.msra.mxu0 %v96_v5  ;;  %532 = vmatpush3.msra.mxu1 %v202_v13  ;;  %v193_v33 = vld [vmem:[#allocation7 + $0x10] sm:$0xff]  ;;  %v192_v34 = vld [vmem:[#allocation7 + $0x8] sm:$0xff]  ;;  %v191_v35 = vld [vmem:[#allocation7] sm:$0xff] }
  0x3d   :  { %492 = vmatprep.subr.mxu0 %v766_v0  ;;  %533 = vmatprep.subr.mxu1 %v766_v0  ;;  %v312_v36 = vld [vmem:[#allocation8 + $0x78] sm:$0xff]  ;;  %v311_v37 = vld [vmem:[#allocation8 + $0x70] sm:$0xff]  ;;  %v310_v38 = vld [vmem:[#allocation8 + $0x68] sm:$0xff] }
  0x3e   :  { %493 = vmatpush3.msra.mxu0 %v95_v8  ;;  %534 = vmatpush3.msra.mxu1 %v201_v15  ;;  %v309_v39 = vld [vmem:[#allocation8 + $0x60] sm:$0xff]  ;;  %v308_v40 = vld [vmem:[#allocation8 + $0x58] sm:$0xff]  ;;  %v307_v41 = vld [vmem:[#allocation8 + $0x50] sm:$0xff] }
  0x3f   :  { %494 = vmatprep.subr.mxu0 %v766_v0  ;;  %535 = vmatprep.subr.mxu1 %v766_v0  ;;  %v306_v42 = vld [vmem:[#allocation8 + $0x48] sm:$0xff]  ;;  %v305_v56 = vld [vmem:[#allocation8 + $0x40] sm:$0xff]  ;;  %v304_v57 = vld [vmem:[#allocation8 + $0x38] sm:$0xff] }
  0x40   :  { %495 = vmatpush3.msra.mxu0 %v94_v10  ;;  %536 = vmatpush3.msra.mxu1 %v200_v17  ;;  %v422_v43 = vld [vmem:[%s932_s2] ss:$0 sm:$0xff]  ;;  %v303_v58 = vld [vmem:[#allocation8 + $0x30] sm:$0xff]  ;;  %v301_v60 = vld [vmem:[#allocation8 + $0x20] sm:$0xff] }
  0x41   :  { %496 = vmatprep.subr.mxu0 %v766_v0  ;;  %537 = vmatprep.subr.mxu1 %v766_v0  ;;  %v302_v59 = vld [vmem:[#allocation8 + $0x28] sm:$0xff]  ;;  %v300_v61 = vld [vmem:[#allocation8 + $0x18] sm:$0xff]  ;;  %v299_v62 = vld [vmem:[#allocation8 + $0x10] sm:$0xff] }
  0x42   :  { %497 = vmatpush3.msra.mxu0 %v93_v12  ;;  %538 = vmatpush3.msra.mxu1 %v199_v19  ;;  %v298_v63 = vld [vmem:[#allocation8 + $0x8] sm:$0xff]  ;;  %v297_v1 = vld [vmem:[#allocation8] sm:$0xff] }
  0x43   :  { %498 = vmatprep.subr.mxu0 %v766_v0  ;;  %539 = vmatprep.subr.mxu1 %v766_v0  ;;  %v423_v2 = vld [vmem:[%s934_s4] ss:$0 sm:$0xff] }
  0x44   :  { %499 = vmatpush3.msra.mxu0 %v92_v14  ;;  %540 = vmatpush3.msra.mxu1 %v198_v21  ;;  %v424_v15 = vld [vmem:[%s936_s6] ss:$0 sm:$0xff] }
  0x45   :  { %500 = vmatprep.subr.mxu0 %v766_v0  ;;  %541 = vmatprep.subr.mxu1 %v766_v0 }
  0x46   :  { %501 = vmatpush3.msra.mxu0 %v91_v16  ;;  %542 = vmatpush3.msra.mxu1 %v197_v23 }
  0x47   :  { %502 = vmatprep.subr.mxu0 %v766_v0  ;;  %543 = vmatprep.subr.mxu1 %v766_v0 }
  0x48   :  { %503 = vmatpush3.msra.mxu0 %v90_v18  ;;  %544 = vmatpush3.msra.mxu1 %v196_v25 }
  0x49   :  { %504 = vmatprep.subr.mxu0 %v766_v0  ;;  %545 = vmatprep.subr.mxu1 %v766_v0 }
  0x4a   :  { %505 = vmatpush3.msra.mxu0 %v89_v20  ;;  %546 = vmatpush3.msra.mxu1 %v195_v27 }
  0x4b   :  { %506 = vmatprep.subr.mxu0 %v766_v0  ;;  %547 = vmatprep.subr.mxu1 %v766_v0 }
  0x4c   :  { %507 = vmatpush3.msra.mxu0 %v88_v22  ;;  %548 = vmatpush3.msra.mxu1 %v194_v29 }
  0x4d   :  { %508 = vmatprep.subr.mxu0 %v766_v0  ;;  %549 = vmatprep.subr.mxu1 %v766_v0 }
  0x4e   :  { %509 = vmatpush3.msra.mxu0 %v87_v24  ;;  %550 = vmatpush3.msra.mxu1 %v193_v33 }
  0x4f   :  { %510 = vmatprep.subr.mxu0 %v766_v0  ;;  %551 = vmatprep.subr.mxu1 %v766_v0 }
  0x50   :  { %511 = vmatpush3.msra.mxu0 %v86_v26  ;;  %552 = vmatpush3.msra.mxu1 %v192_v34 }
  0x51   :  { %512 = vmatprep.subr.mxu0 %v766_v0  ;;  %553 = vmatprep.subr.mxu1 %v766_v0 }
  0x52   :  { %513 = vmatpush3.msra.mxu0 %v85_v28  ;;  %554 = vmatpush3.msra.mxu1 %v191_v35 }
  0x53   :  { %515 = vmatmul.mubr.f32.vlgmr.msra.gmra.mxu0 %v82_v30  ;;  %564 = vmatprep.subr.mxu0 %v766_v0 }
  0x54   :  { %517 = vmatprep.mubr.msk.f32.mxu0 %vm767_vm0, %v766_v0  ;;  %605 = vmatprep.subr.mxu1 %v766_v0 }
  0x55   :  { %565 = vmatpush3.msra.mxu0 %v312_v36 }
  0x56   :  { %566 = vmatprep.subr.mxu0 %v766_v0 }
  0x57   :  { %518 = vmatmul.mubr.f32.gmra.mxu0 %v83_v31 }
  0x58   :  { %520 = vmatprep.mubr.msk.f32.mxu0 %vm767_vm0, %v766_v0  ;;  %567 = vmatpush3.msra.mxu0 %v311_v37 }
  0x59   :  { %568 = vmatprep.subr.mxu0 %v766_v0 }
  0x5a   :  { %569 = vmatpush3.msra.mxu0 %v310_v38 }
  0x5b   :  { %521 = vmatmul.mubr.f32.gmra.mxu0 %v84_v32  ;;  %570 = vmatprep.subr.mxu0 %v766_v0 }
  0x5c   :  { %596 = vmatprep.mubr.msk.f32.mxu0 %vm767_vm0, %v766_v0  ;;  %571 = vmatpush3.msra.mxu0 %v309_v39 }
  0x5d   :  { %572 = vmatprep.subr.mxu0 %v766_v0 }
  0x5e   :  { %573 = vmatpush3.msra.mxu0 %v308_v40 }
  0x5f   :  { %574 = vmatprep.subr.mxu0 %v766_v0 }
  0x60   :  { %575 = vmatpush3.msra.mxu0 %v307_v41 }
  0x61   :  { %576 = vmatprep.subr.mxu0 %v766_v0 }
  0x62   :  { %577 = vmatpush3.msra.mxu0 %v306_v42 }
  0x63   :  { %578 = vmatprep.subr.mxu0 %v766_v0 }
  0x64   :  { %579 = vmatpush3.msra.mxu0 %v305_v56 }
  0x65   :  { %580 = vmatprep.subr.mxu0 %v766_v0 }
  0x66   :  { %581 = vmatpush3.msra.mxu0 %v304_v57 }
  0x67   :  { %582 = vmatprep.subr.mxu0 %v766_v0 }
  0x68   :  { %583 = vmatpush3.msra.mxu0 %v303_v58 }
  0x69   :  { %584 = vmatprep.subr.mxu0 %v766_v0 }
  0x6a   :  { %585 = vmatpush3.msra.mxu0 %v302_v59 }
  0x6b   :  { %586 = vmatprep.subr.mxu0 %v766_v0 }
  0x6c   :  { %587 = vmatpush3.msra.mxu0 %v301_v60 }
  0x6d   :  { %588 = vmatprep.subr.mxu0 %v766_v0 }
  0x6e   :  { %589 = vmatpush3.msra.mxu0 %v300_v61 }
  0x6f   :  { %590 = vmatprep.subr.mxu0 %v766_v0 }
  0x70   :  { %591 = vmatpush3.msra.mxu0 %v299_v62 }
  0x71   :  { %592 = vmatprep.subr.mxu0 %v766_v0 }
  0x72   :  { %593 = vmatpush3.msra.mxu0 %v298_v63 }
  0x73   :  { %594 = vmatprep.subr.mxu0 %v766_v0 }
  0x74   :  { %595 = vmatpush3.msra.mxu0 %v297_v1 }
 0x113   :  { %v174_v44 = vpop.f32.mrf.mxu0 }
 0x114   :  { %v175_v45 = vadd.f32 %v422_v43, %v174_v44 }
 0x115   :  { %v516_v46 = vpop.f32.mrf.mxu0 }
 0x116   :  { %v188_v47 = vmax.f32 %v175_v45, 0.0 }
 0x117   :  { %v179_v48 = vpop.f32.mrf.mxu0 }
 0x118   :  { %v180_v49 = vadd.f32 %v422_v43, %v179_v48  ;;  %556 = vmatmul.mubr.f32.vlgmr.msra.gmra.mxu1 %v188_v47 }
 0x119   :  { %v519_v50 = vpop.f32.mrf.mxu0  ;;  %558 = vmatprep.mubr.msk.f32.mxu1 %vm767_vm0, %v766_v0  ;;  %621 = vmatpush3.msra.mxu1 %v312_v36 }
 0x11a   :  { %v189_v51 = vmax.f32 %v180_v49, 0.0  ;;  %606 = vmatprep.subr.mxu1 %v766_v0 }
 0x11b   :  { %v184_v52 = vpop.f32.mrf.mxu0  ;;  %622 = vmatpush3.msra.mxu1 %v311_v37 }
 0x11c   :  { %v185_v53 = vadd.f32 %v422_v43, %v184_v52  ;;  %559 = vmatmul.mubr.f32.gmra.mxu1 %v189_v51  ;;  %607 = vmatprep.subr.mxu1 %v766_v0 }
 0x11d   :  { %v522_v54 = vpop.f32.mrf.mxu0  ;;  %561 = vmatprep.mubr.msk.f32.mxu1 %vm767_vm0, %v766_v0  ;;  %623 = vmatpush3.msra.mxu1 %v310_v38 }
 0x11e   :  { %v190_v55 = vmax.f32 %v185_v53, 0.0  ;;  %608 = vmatprep.subr.mxu1 %v766_v0 }
 0x11f   :  { %624 = vmatpush3.msra.mxu1 %v309_v39 }
 0x120   :  { %562 = vmatmul.mubr.f32.gmra.mxu1 %v190_v55  ;;  %609 = vmatprep.subr.mxu1 %v766_v0 }
 0x121   :  { %625 = vmatpush3.msra.mxu1 %v308_v40  ;;  %599 = vmatprep.mubr.msk.f32.mxu1 %vm767_vm0, %v766_v0 }
 0x122   :  { %610 = vmatprep.subr.mxu1 %v766_v0 }
 0x123   :  { %626 = vmatpush3.msra.mxu1 %v307_v41 }
 0x124   :  { %611 = vmatprep.subr.mxu1 %v766_v0 }
 0x125   :  { %627 = vmatpush3.msra.mxu1 %v306_v42 }
 0x126   :  { %612 = vmatprep.subr.mxu1 %v766_v0 }
 0x127   :  { %628 = vmatpush3.msra.mxu1 %v305_v56 }
 0x128   :  { %613 = vmatprep.subr.mxu1 %v766_v0 }
 0x129   :  { %629 = vmatpush3.msra.mxu1 %v304_v57 }
 0x12a   :  { %614 = vmatprep.subr.mxu1 %v766_v0 }
 0x12b   :  { %630 = vmatpush3.msra.mxu1 %v303_v58 }
 0x12c   :  { %615 = vmatprep.subr.mxu1 %v766_v0 }
 0x12d   :  { %631 = vmatpush3.msra.mxu1 %v302_v59 }
 0x12e   :  { %616 = vmatprep.subr.mxu1 %v766_v0 }
 0x12f   :  { %632 = vmatpush3.msra.mxu1 %v301_v60 }
 0x130   :  { %617 = vmatprep.subr.mxu1 %v766_v0 }
 0x131   :  { %633 = vmatpush3.msra.mxu1 %v300_v61 }
 0x132   :  { %618 = vmatprep.subr.mxu1 %v766_v0 }
 0x133   :  { %634 = vmatpush3.msra.mxu1 %v299_v62 }
 0x134   :  { %619 = vmatprep.subr.mxu1 %v766_v0 }
 0x135   :  { %635 = vmatpush3.msra.mxu1 %v298_v63 }
 0x136   :  { %620 = vmatprep.subr.mxu1 %v766_v0 }
 0x137   :  { %636 = vmatpush3.msra.mxu1 %v297_v1 }
 0x1d8   :  { %v280_v3 = vpop.f32.mrf.mxu1 }
 0x1d9   :  { %v281_v4 = vadd.f32 %v423_v2, %v280_v3 }
 0x1da   :  { %v557_v5 = vpop.f32.mrf.mxu1 }
 0x1db   :  { %646 = vtanh.f32 %v281_v4 }
 0x1dc   :  { %v285_v6 = vpop.f32.mrf.mxu1 }
 0x1dd   :  { %v286_v7 = vadd.f32 %v423_v2, %v285_v6 }
 0x1de   :  { %v560_v8 = vpop.f32.mrf.mxu1 }
 0x1df   :  { %648 = vtanh.f32 %v286_v7 }
 0x1e0   :  { %v290_v9 = vpop.f32.mrf.mxu1 }
 0x1e1   :  { %v291_v10 = vadd.f32 %v423_v2, %v290_v9 }
 0x1e2   :  { %v563_v11 = vpop.f32.mrf.mxu1 }
 0x1e3   :  { %650 = vtanh.f32 %v291_v10 }
 0x1e8   :  { %v647_v12 = vpop.eup %646 }
 0x1e9   :  { %597 = vmatmul.mubr.f32.vlgmr.msra.gmra.mxu0 %v647_v12 }
 0x1ec   :  { %v649_v13 = vpop.eup %648 }
 0x1ed   :  { %600 = vmatmul.mubr.f32.vlgmr.msra.gmra.mxu1 %v649_v13 }
 0x1ee   :  { %602 = vmatprep.mubr.msk.f32.mxu1 %vm767_vm0, %v766_v0 }
 0x1f0   :  { %v651_v14 = vpop.eup %650 }
 0x1f1   :  { %603 = vmatmul.mubr.f32.gmra.mxu1 %v651_v14 }
 0x2a9   :  { %v386_v16 = vpop.f32.mrf.mxu0 }
 0x2aa   :  { %v387_v17 = vadd.f32 %v424_v15, %v386_v16 }
 0x2ab   :  { %v598_v18 = vpop.f32.mrf.mxu0 }
 0x2ac   :  { %400 = vst [vmem:[#allocation10] sm:$0xff] %v387_v17 }
 0x2ad   :  { %v391_v19 = vpop.f32.mrf.mxu1 }
 0x2ae   :  { %v392_v20 = vadd.f32 %v424_v15, %v391_v19 }
 0x2af   :  { %v601_v21 = vpop.f32.mrf.mxu1 }
 0x2b0   :  { %401 = vst [vmem:[#allocation10 + $0x8] sm:$0xff] %v392_v20 }
 0x2b1   :  { %v396_v22 = vpop.f32.mrf.mxu1 }
 0x2b2   :  { %v397_v23 = vadd.f32 %v424_v15, %v396_v22 }
 0x2b3   :  { %v604_v0 = vpop.f32.mrf.mxu1 }
 0x2b4   :  { %402 = vst [vmem:[#allocation10 + $0x10] sm:$0xff] %v397_v23 }
 0x2b5   :  { %743 = shalt.err (!%p740_p10)
}
 0x2b6   :  { %414 = dma.vmem_to_hbm [thread:$0]  %s409_s24, 384, %s937_s7, [#allocation4], %s762_s29, %s762_s29, %s763_s30  }
 0x2b7   :  { %758 = dma.done.wait [#allocation4], 384  }
 0x2b8   :  { %759 = vsyncadd [#allocation4], 4294966912 }
 0x2b9   :  { %418 = vsyncpa [#allocation3], 1 }
 0x2ba   :  { %419 = vsyncpa [#allocation6], 1 }
 0x2bb   :  { %420 = vsyncpa [#allocation9], 1 }
 0x2bc   :  { %421 = vsyncpa [#allocation4], 1 }

</bundles_post_ra>
